<compile_context>
chip_gen: v6e
topology: v6e:2x2x1
jax: 0.10.0
libtpu: 0.0.40
codegen_flags: <defaults>
</compile_context>

<pallas_src>
import jax
import jax.numpy as jnp
from jax.experimental import pallas as pl
from jax.experimental.pallas import tpu as pltpu

IMG_SCALE = 1.0 / 255.0
MEAN = (0.485, 0.456, 0.406)                       # scalar literals, not arrays
INV_STD = (1.0 / 0.229, 1.0 / 0.224, 1.0 / 0.225)
EPS = 0.0                                          # module eps argument
DILATE_R = 2                                       # dilate_kernel=2 -> k=5, pad=2
L1_EPS = 1e-6


def _shift2d_zero(x, sy, sx):
    """out[i, j] = x[i + sy, j + sx], zero-filled outside (pure value ops)."""
    H, W = x.shape
    if sy > 0:
        x = jnp.concatenate([x[sy:, :], jnp.zeros((sy, W), x.dtype)], axis=0)
    elif sy < 0:
        x = jnp.concatenate([jnp.zeros((-sy, W), x.dtype), x[:H + sy, :]], axis=0)
    if sx > 0:
        x = jnp.concatenate([x[:, sx:], jnp.zeros((H, sx), x.dtype)], axis=1)
    elif sx < 0:
        x = jnp.concatenate([jnp.zeros((H, -sx), x.dtype), x[:, :W + sx]], axis=1)
    return x


def _clamp_eps(gt):
    gtc = jnp.where(gt < EPS, 0.0, gt)
    return jnp.where(gtc > 1.0 - EPS, 1.0, gtc)


def _dilate_trimask(tm, R):
    """Separable (2R+1)^2 max-pool, stride 1, pad R.  Zero pad == -inf pad here
    because tm is in {0, 1}."""
    r = tm
    for d in range(1, R + 1):
        r = jnp.maximum(r, _shift2d_zero(tm, d, 0))
        r = jnp.maximum(r, _shift2d_zero(tm, -d, 0))
    out = r
    for d in range(1, R + 1):
        out = jnp.maximum(out, _shift2d_zero(r, 0, d))
        out = jnp.maximum(out, _shift2d_zero(r, 0, -d))
    return out


# ---------------------------------------------------------------------------
# Kernel 1: per-frame preprocessing + trimap1 (all B*T frames).
#   Only what is actually consumed later is written back:
#   scaled_gt, scaled_fg (BGR), scaled_bg (BGR), scaled_img, trimap1.
# ---------------------------------------------------------------------------
def _preprocess_kernel(a_ref, fg_ref, bg_ref,
                       sgt_ref, sfg_ref, sbg_ref, simg_ref, tri1_ref):
    gt = a_ref[0, 0] * IMG_SCALE                 # (H, W)
    sgt_ref[0, 0] = gt
    inv = 1.0 - gt
    for ci in range(3):
        f = fg_ref[0, 2 - ci] * IMG_SCALE        # torch .flip([2]) done in-kernel
        b = bg_ref[0, 2 - ci] * IMG_SCALE
        sfg_ref[0, ci] = f
        sbg_ref[0, ci] = b
        simg_ref[0, ci] = f * gt + b * inv

    gtc = _clamp_eps(gt)
    tm = jnp.logical_and(gtc > 0.0, gtc < 1.0).astype(jnp.float32)
    tri = _dilate_trimask(tm, DILATE_R)
    tri1_ref[0, 0] = jnp.where(tri > 0.5, 128.0 * IMG_SCALE, gtc)


def preprocess_trimap(a4, fg4, bg4):
    N, _, H, W = a4.shape
    spec1 = pl.BlockSpec((1, 1, H, W), lambda i: (i, 0, 0, 0))
    spec3 = pl.BlockSpec((1, 3, H, W), lambda i: (i, 0, 0, 0))
    out_shape = (
        jax.ShapeDtypeStruct((N, 1, H, W), jnp.float32),   # scaled_gt
        jax.ShapeDtypeStruct((N, 3, H, W), jnp.float32),   # scaled_fg (BGR)
        jax.ShapeDtypeStruct((N, 3, H, W), jnp.float32),   # scaled_bg (BGR)
        jax.ShapeDtypeStruct((N, 3, H, W), jnp.float32),   # scaled_img
        jax.ShapeDtypeStruct((N, 1, H, W), jnp.float32),   # trimap1
    )
    return pl.pallas_call(
        _preprocess_kernel,
        out_shape=out_shape,
        grid=(N,),
        in_specs=[spec1, spec3, spec3],
        out_specs=(spec1, spec3, spec3, spec3, spec1),
        compiler_params=pltpu.CompilerParams(dimension_semantics=("parallel",)),
    )(a4, fg4, bg4)


# ---------------------------------------------------------------------------
# Kernel 2: center frame only — recompute trimap bits + normalization in VMEM,
# stand-in prediction net + single_image_loss.  Grid over B ("parallel"),
# per-batch loss partial sums emitted to a blocked (B,1,8) output; alphas/comps
# written in-place into pre-zeroed aliased buffers at block (b, c).
# ---------------------------------------------------------------------------
def _make_center_kernel(H, W):
    def kernel(w_ref, sgt_ref, sfg_ref, sbg_ref, simg_ref, az_ref, cz_ref,
               alpha_ref, comp_ref, part_ref):
        del az_ref, cz_ref                       # aliased zero buffers (unread)

        gt = sgt_ref[0, 0, 0]                    # (H, W) scaled center alpha
        fg = sfg_ref[0, 0]                       # (3, H, W)
        bg = sbg_ref[0, 0]
        simg = simg_ref[0, 0]

        # ---- recompute center-frame trimask / trimap1 (cheap, saves HBM) ----
        gtc = _clamp_eps(gt)
        tm = jnp.logical_and(gtc > 0.0, gtc < 1.0).astype(jnp.float32)
        mask = _dilate_trimask(tm, DILATE_R)     # dilated trimask in {0, 1}
        t1 = jnp.where(mask > 0.5, 128.0 * IMG_SCALE, gtc)

        # ---- normalized image channels (scalar mean/std literals) ----
        chans = [(simg[ci] - MEAN[ci]) * INV_STD[ci] for ci in range(3)] + [t1]

        # ---- stand-in prediction network: 3x3 conv (4 -> 1), pad 1, sigmoid ----
        # TODO(synk): DIM_VGG encoder/decoder is not available in this repo; a
        # deterministic conv+sigmoid keeps the data flow (imgs ++ trimap1 -> alpha).
        # Channels are pre-combined per tap, then shifted once per tap (9 shifts).
        conv = jnp.zeros((H, W), jnp.float32) + w_ref[36]          # bias
        for dy in (-1, 0, 1):
            row_acc = None
            for dx in (-1, 0, 1):
                tap = None
                for ci in range(4):
                    wv = w_ref[ci * 9 + (dy + 1) * 3 + (dx + 1)]
                    term = wv * chans[ci]
                    tap = term if tap is None else tap + term
                sh = _shift2d_zero(tap, dy, dx)
                row_acc = sh if row_acc is None else row_acc + sh
            conv = conv + row_acc
        pred = jax.nn.sigmoid(conv)

        # ---- single_image_loss (center frame) ----
        refine = jnp.where(mask > 0.5, pred, gt)
        alpha_ref[0, 0, 0] = jnp.clip(refine, 0.0, 1.0)
        comp = [fg[ci] * refine + bg[ci] * (1.0 - refine) for ci in range(3)]
        for ci in range(3):
            comp_ref[0, 0, ci] = jnp.clip(comp[ci], 0.0, 1.0)

        # TODO(synk): external L.L1_mask / L.L1_grad unavailable; standard masked
        # L1 and forward-difference gradient L1 (mask at the left endpoint) used.
        s_alpha = jnp.sum(jnp.abs(refine - gt) * mask)
        s_comp = (jnp.sum(jnp.abs(comp[0] - simg[0]) * mask)
                  + jnp.sum(jnp.abs(comp[1] - simg[1]) * mask)
                  + jnp.sum(jnp.abs(comp[2] - simg[2]) * mask))
        gx_d = (refine[:, 1:] - refine[:, :-1]) - (gt[:, 1:] - gt[:, :-1])
        gy_d = (refine[1:, :] - refine[:-1, :]) - (gt[1:, :] - gt[:-1, :])
        mx = mask[:, 1:]
        my = mask[1:, :]
        s_gx = jnp.sum(jnp.abs(gx_d) * mx)
        s_gy = jnp.sum(jnp.abs(gy_d) * my)
        s_m = jnp.sum(mask)
        s_mx = jnp.sum(mx)
        s_my = jnp.sum(my)

        lane = jax.lax.broadcasted_iota(jnp.int32, (1, 8), 1)
        part_ref[0] = (jnp.where(lane == 0, s_alpha, 0.0)
                       + jnp.where(lane == 1, s_comp, 0.0)
                       + jnp.where(lane == 2, s_gx, 0.0)
                       + jnp.where(lane == 3, s_gy, 0.0)
                       + jnp.where(lane == 4, s_m, 0.0)
                       + jnp.where(lane == 5, s_mx, 0.0)
                       + jnp.where(lane == 6, s_my, 0.0))

    return kernel


def center_net_loss(w_flat, sgt5, sfg5, sbg5, simg5, alphas_init, comps_init, c):
    B, T, _, H, W = sgt5.shape
    spec1 = pl.BlockSpec((1, 1, 1, H, W), lambda b: (b, c, 0, 0, 0))
    spec3 = pl.BlockSpec((1, 1, 3, H, W), lambda b: (b, c, 0, 0, 0))
    out_shape = (
        jax.ShapeDtypeStruct((B, T, 1, H, W), jnp.float32),   # alphas (full)
        jax.ShapeDtypeStruct((B, T, 3, H, W), jnp.float32),   # comps  (full)
        jax.ShapeDtypeStruct((B, 1, 8), jnp.float32),         # per-batch partials
    )
    return pl.pallas_call(
        _make_center_kernel(H, W),
        out_shape=out_shape,
        grid=(B,),
        in_specs=[pl.BlockSpec(memory_space=pltpu.MemorySpace.SMEM),   # conv w+b
                  spec1, spec3, spec3, spec3,
                  spec1, spec3],                                       # aliased zeros
        out_specs=(spec1, spec3, pl.BlockSpec((1, 1, 8), lambda b: (b, 0, 0))),
        input_output_aliases={5: 0, 6: 1},
        compiler_params=pltpu.CompilerParams(dimension_semantics=("parallel",)),
    )(w_flat, sgt5, sfg5, sbg5, simg5, alphas_init, comps_init)


# ---------------------------------------------------------------------------
# Full forward (method='dim', TRIMAP_CHANNEL=1, non-vmn branch)
# ---------------------------------------------------------------------------
def full_model_forward(a, fg, bg, w, bias):
    B, T, _, H, W = a.shape
    N = B * T
    c = T // 2

    # free contiguous reshapes only — no host-side flips / copies
    a4 = a.reshape(N, 1, H, W)
    fg4 = fg.reshape(N, 3, H, W)
    bg4 = bg.reshape(N, 3, H, W)

    sgt, sfg, sbg, simg, tri1 = preprocess_trimap(a4, fg4, bg4)

    scaled_gts = sgt.reshape(B, T, 1, H, W)
    scaled_fgs = sfg.reshape(B, T, 3, H, W)
    scaled_bgs = sbg.reshape(B, T, 3, H, W)
    scaled_imgs = simg.reshape(B, T, 3, H, W)
    tris = tri1.reshape(B, T, 1, H, W)        # TRIMAP_CHANNEL == 1 -> 'trimap1'

    w_flat = jnp.concatenate([jnp.asarray(w, jnp.float32).reshape(-1),
                              jnp.asarray([bias], jnp.float32)])   # (37,) -> SMEM

    # pre-zeroed full outputs; kernel 2 writes only block (b, c) via aliasing
    alphas_init = jnp.zeros((B, T, 1, H, W), jnp.float32)
    comps_init = jnp.zeros((B, T, 3, H, W), jnp.float32)

    alphas, comps, partial = center_net_loss(
        w_flat, scaled_gts, scaled_fgs, scaled_bgs, scaled_imgs,
        alphas_init, comps_init, c)

    # reduce per-batch partials to the 3 scalar losses (trivial trailing op)
    sums = jnp.sum(partial[:, 0, :], axis=0)
    loss1 = sums[0] / (sums[4] + L1_EPS)                          # L_alpha
    loss2 = sums[1] / (sums[4] + L1_EPS)                          # L_comp
    loss3 = sums[2] / (sums[5] + L1_EPS) + sums[3] / (sums[6] + L1_EPS)   # L_grad

    tris_vis = tris                       # TRIMAP_CHANNEL == 1 branch
    Fs, Bs = scaled_fgs, scaled_bgs
    return [loss1, loss2, loss3, scaled_imgs, tris_vis, alphas, comps,
            scaled_gts, Fs, Bs]


if __name__ == "__main__":
    key = jax.random.PRNGKey(0)
    ka, kf, kb, kw = jax.random.split(key, 4)
    B, T, H, W = 2, 3, 16, 16
    a = jax.random.uniform(ka, (B, T, 1, H, W), jnp.float32, 0.0, 255.0)
    fg = jax.random.uniform(kf, (B, T, 3, H, W), jnp.float32, 0.0, 255.0)
    bg = jax.random.uniform(kb, (B, T, 3, H, W), jnp.float32, 0.0, 255.0)
    # deterministic stand-in network parameters (4 -> 1, 3x3 conv)
    w = jax.random.normal(kw, (4, 3, 3), jnp.float32) * 0.1
    bias = 0.0

    outs = full_model_forward(a, fg, bg, w, bias)
    outs = jax.block_until_ready(outs)
    print("KERNEL_OK")
</pallas_src>

<mosaic_0001>
module attributes {stable_mosaic.version = 11 : i64} {
  func.func @_preprocess_kernel(%arg0: i32, %arg1: memref<1x1x16x16xf32, #tpu.memory_space<vmem>>, %arg2: memref<1x3x16x16xf32, #tpu.memory_space<vmem>>, %arg3: memref<1x3x16x16xf32, #tpu.memory_space<vmem>>, %arg4: memref<1x1x16x16xf32, #tpu.memory_space<vmem>>, %arg5: memref<1x3x16x16xf32, #tpu.memory_space<vmem>>, %arg6: memref<1x3x16x16xf32, #tpu.memory_space<vmem>>, %arg7: memref<1x3x16x16xf32, #tpu.memory_space<vmem>>, %arg8: memref<1x1x16x16xf32, #tpu.memory_space<vmem>>) attributes {dimension_semantics = [#tpu.dimension_semantics<parallel>], iteration_bounds = array<i64: 6>, scalar_prefetch = 0 : i64, scratch_operands = 0 : i64, tpu.core_type = #tpu.core_type<tc>, window_params = [{transform_indices = @transform_0, window_bounds = array<i64: 1, 1, 16, 16>}, {transform_indices = @transform_1, window_bounds = array<i64: 1, 3, 16, 16>}, {transform_indices = @transform_2, window_bounds = array<i64: 1, 3, 16, 16>}, {transform_indices = @transform_3, window_bounds = array<i64: 1, 1, 16, 16>}, {transform_indices = @transform_4, window_bounds = array<i64: 1, 3, 16, 16>}, {transform_indices = @transform_5, window_bounds = array<i64: 1, 3, 16, 16>}, {transform_indices = @transform_6, window_bounds = array<i64: 1, 3, 16, 16>}, {transform_indices = @transform_7, window_bounds = array<i64: 1, 1, 16, 16>}]} {
    %c0 = arith.constant 0 : index
    %c0_0 = arith.constant 0 : index
    %c0_1 = arith.constant 0 : index
    %c0_2 = arith.constant 0 : index
    %0 = vector.load %arg1[%c0, %c0_0, %c0_1, %c0_2] : memref<1x1x16x16xf32, #tpu.memory_space<vmem>>, vector<1x1x16x16xf32>
    %1 = vector.shape_cast %0 : vector<1x1x16x16xf32> to vector<16x16xf32>
    %cst = arith.constant 0.00392156886 : f32
    %2 = vector.broadcast %cst : f32 to vector<16x16xf32>
    %3 = arith.mulf %1, %2 : vector<16x16xf32>
    %c0_3 = arith.constant 0 : index
    %c0_4 = arith.constant 0 : index
    %c0_5 = arith.constant 0 : index
    %c0_6 = arith.constant 0 : index
    %4 = vector.load %arg4[%c0_3, %c0_4, %c0_5, %c0_6] : memref<1x1x16x16xf32, #tpu.memory_space<vmem>>, vector<1x1x16x16xf32>
    %5 = vector.shape_cast %4 : vector<1x1x16x16xf32> to vector<16x16xf32>
    %6 = vector.shape_cast %3 : vector<16x16xf32> to vector<1x1x16x16xf32>
    tpu.vector_store %arg4[%c0_3, %c0_4, %c0_5, %c0_6], %6 {strides = array<i32>} : memref<1x1x16x16xf32, #tpu.memory_space<vmem>>, vector<1x1x16x16xf32>,
    %cst_7 = arith.constant 1.000000e+00 : f32
    %7 = vector.broadcast %cst_7 : f32 to vector<16x16xf32>
    %8 = arith.subf %7, %3 : vector<16x16xf32>
    %c0_8 = arith.constant 0 : index
    %c2 = arith.constant 2 : index
    %c0_9 = arith.constant 0 : index
    %c0_10 = arith.constant 0 : index
    %9 = vector.load %arg2[%c0_8, %c2, %c0_9, %c0_10] : memref<1x3x16x16xf32, #tpu.memory_space<vmem>>, vector<1x1x16x16xf32>
    %10 = vector.shape_cast %9 : vector<1x1x16x16xf32> to vector<16x16xf32>
    %cst_11 = arith.constant 0.00392156886 : f32
    %11 = vector.broadcast %cst_11 : f32 to vector<16x16xf32>
    %12 = arith.mulf %10, %11 : vector<16x16xf32>
    %c0_12 = arith.constant 0 : index
    %c2_13 = arith.constant 2 : index
    %c0_14 = arith.constant 0 : index
    %c0_15 = arith.constant 0 : index
    %13 = vector.load %arg3[%c0_12, %c2_13, %c0_14, %c0_15] : memref<1x3x16x16xf32, #tpu.memory_space<vmem>>, vector<1x1x16x16xf32>
    %14 = vector.shape_cast %13 : vector<1x1x16x16xf32> to vector<16x16xf32>
    %cst_16 = arith.constant 0.00392156886 : f32
    %15 = vector.broadcast %cst_16 : f32 to vector<16x16xf32>
    %16 = arith.mulf %14, %15 : vector<16x16xf32>
    %c0_17 = arith.constant 0 : index
    %c0_18 = arith.constant 0 : index
    %c0_19 = arith.constant 0 : index
    %c0_20 = arith.constant 0 : index
    %17 = vector.load %arg5[%c0_17, %c0_18, %c0_19, %c0_20] : memref<1x3x16x16xf32, #tpu.memory_space<vmem>>, vector<1x1x16x16xf32>
    %18 = vector.shape_cast %17 : vector<1x1x16x16xf32> to vector<16x16xf32>
    %19 = vector.shape_cast %12 : vector<16x16xf32> to vector<1x1x16x16xf32>
    tpu.vector_store %arg5[%c0_17, %c0_18, %c0_19, %c0_20], %19 {strides = array<i32>} : memref<1x3x16x16xf32, #tpu.memory_space<vmem>>, vector<1x1x16x16xf32>,
    %c0_21 = arith.constant 0 : index
    %c0_22 = arith.constant 0 : index
    %c0_23 = arith.constant 0 : index
    %c0_24 = arith.constant 0 : index
    %20 = vector.load %arg6[%c0_21, %c0_22, %c0_23, %c0_24] : memref<1x3x16x16xf32, #tpu.memory_space<vmem>>, vector<1x1x16x16xf32>
    %21 = vector.shape_cast %20 : vector<1x1x16x16xf32> to vector<16x16xf32>
    %22 = vector.shape_cast %16 : vector<16x16xf32> to vector<1x1x16x16xf32>
    tpu.vector_store %arg6[%c0_21, %c0_22, %c0_23, %c0_24], %22 {strides = array<i32>} : memref<1x3x16x16xf32, #tpu.memory_space<vmem>>, vector<1x1x16x16xf32>,
    %23 = arith.mulf %12, %3 : vector<16x16xf32>
    %24 = arith.mulf %16, %8 : vector<16x16xf32>
    %25 = arith.addf %23, %24 : vector<16x16xf32>
    %c0_25 = arith.constant 0 : index
    %c0_26 = arith.constant 0 : index
    %c0_27 = arith.constant 0 : index
    %c0_28 = arith.constant 0 : index
    %26 = vector.load %arg7[%c0_25, %c0_26, %c0_27, %c0_28] : memref<1x3x16x16xf32, #tpu.memory_space<vmem>>, vector<1x1x16x16xf32>
    %27 = vector.shape_cast %26 : vector<1x1x16x16xf32> to vector<16x16xf32>
    %28 = vector.shape_cast %25 : vector<16x16xf32> to vector<1x1x16x16xf32>
    tpu.vector_store %arg7[%c0_25, %c0_26, %c0_27, %c0_28], %28 {strides = array<i32>} : memref<1x3x16x16xf32, #tpu.memory_space<vmem>>, vector<1x1x16x16xf32>,
    %c0_29 = arith.constant 0 : index
    %c1 = arith.constant 1 : index
    %c0_30 = arith.constant 0 : index
    %c0_31 = arith.constant 0 : index
    %29 = vector.load %arg2[%c0_29, %c1, %c0_30, %c0_31] : memref<1x3x16x16xf32, #tpu.memory_space<vmem>>, vector<1x1x16x16xf32>
    %30 = vector.shape_cast %29 : vector<1x1x16x16xf32> to vector<16x16xf32>
    %cst_32 = arith.constant 0.00392156886 : f32
    %31 = vector.broadcast %cst_32 : f32 to vector<16x16xf32>
    %32 = arith.mulf %30, %31 : vector<16x16xf32>
    %c0_33 = arith.constant 0 : index
    %c1_34 = arith.constant 1 : index
    %c0_35 = arith.constant 0 : index
    %c0_36 = arith.constant 0 : index
    %33 = vector.load %arg3[%c0_33, %c1_34, %c0_35, %c0_36] : memref<1x3x16x16xf32, #tpu.memory_space<vmem>>, vector<1x1x16x16xf32>
    %34 = vector.shape_cast %33 : vector<1x1x16x16xf32> to vector<16x16xf32>
    %cst_37 = arith.constant 0.00392156886 : f32
    %35 = vector.broadcast %cst_37 : f32 to vector<16x16xf32>
    %36 = arith.mulf %34, %35 : vector<16x16xf32>
    %c0_38 = arith.constant 0 : index
    %c1_39 = arith.constant 1 : index
    %c0_40 = arith.constant 0 : index
    %c0_41 = arith.constant 0 : index
    %37 = vector.load %arg5[%c0_38, %c1_39, %c0_40, %c0_41] : memref<1x3x16x16xf32, #tpu.memory_space<vmem>>, vector<1x1x16x16xf32>
    %38 = vector.shape_cast %37 : vector<1x1x16x16xf32> to vector<16x16xf32>
    %39 = vector.shape_cast %32 : vector<16x16xf32> to vector<1x1x16x16xf32>
    tpu.vector_store %arg5[%c0_38, %c1_39, %c0_40, %c0_41], %39 {strides = array<i32>} : memref<1x3x16x16xf32, #tpu.memory_space<vmem>>, vector<1x1x16x16xf32>,
    %c0_42 = arith.constant 0 : index
    %c1_43 = arith.constant 1 : index
    %c0_44 = arith.constant 0 : index
    %c0_45 = arith.constant 0 : index
    %40 = vector.load %arg6[%c0_42, %c1_43, %c0_44, %c0_45] : memref<1x3x16x16xf32, #tpu.memory_space<vmem>>, vector<1x1x16x16xf32>
    %41 = vector.shape_cast %40 : vector<1x1x16x16xf32> to vector<16x16xf32>
    %42 = vector.shape_cast %36 : vector<16x16xf32> to vector<1x1x16x16xf32>
    tpu.vector_store %arg6[%c0_42, %c1_43, %c0_44, %c0_45], %42 {strides = array<i32>} : memref<1x3x16x16xf32, #tpu.memory_space<vmem>>, vector<1x1x16x16xf32>,
    %43 = arith.mulf %32, %3 : vector<16x16xf32>
    %44 = arith.mulf %36, %8 : vector<16x16xf32>
    %45 = arith.addf %43, %44 : vector<16x16xf32>
    %c0_46 = arith.constant 0 : index
    %c1_47 = arith.constant 1 : index
    %c0_48 = arith.constant 0 : index
    %c0_49 = arith.constant 0 : index
    %46 = vector.load %arg7[%c0_46, %c1_47, %c0_48, %c0_49] : memref<1x3x16x16xf32, #tpu.memory_space<vmem>>, vector<1x1x16x16xf32>
    %47 = vector.shape_cast %46 : vector<1x1x16x16xf32> to vector<16x16xf32>
    %48 = vector.shape_cast %45 : vector<16x16xf32> to vector<1x1x16x16xf32>
    tpu.vector_store %arg7[%c0_46, %c1_47, %c0_48, %c0_49], %48 {strides = array<i32>} : memref<1x3x16x16xf32, #tpu.memory_space<vmem>>, vector<1x1x16x16xf32>,
    %c0_50 = arith.constant 0 : index
    %c0_51 = arith.constant 0 : index
    %c0_52 = arith.constant 0 : index
    %c0_53 = arith.constant 0 : index
    %49 = vector.load %arg2[%c0_50, %c0_51, %c0_52, %c0_53] : memref<1x3x16x16xf32, #tpu.memory_space<vmem>>, vector<1x1x16x16xf32>
    %50 = vector.shape_cast %49 : vector<1x1x16x16xf32> to vector<16x16xf32>
    %cst_54 = arith.constant 0.00392156886 : f32
    %51 = vector.broadcast %cst_54 : f32 to vector<16x16xf32>
    %52 = arith.mulf %50, %51 : vector<16x16xf32>
    %c0_55 = arith.constant 0 : index
    %c0_56 = arith.constant 0 : index
    %c0_57 = arith.constant 0 : index
    %c0_58 = arith.constant 0 : index
    %53 = vector.load %arg3[%c0_55, %c0_56, %c0_57, %c0_58] : memref<1x3x16x16xf32, #tpu.memory_space<vmem>>, vector<1x1x16x16xf32>
    %54 = vector.shape_cast %53 : vector<1x1x16x16xf32> to vector<16x16xf32>
    %cst_59 = arith.constant 0.00392156886 : f32
    %55 = vector.broadcast %cst_59 : f32 to vector<16x16xf32>
    %56 = arith.mulf %54, %55 : vector<16x16xf32>
    %c0_60 = arith.constant 0 : index
    %c2_61 = arith.constant 2 : index
    %c0_62 = arith.constant 0 : index
    %c0_63 = arith.constant 0 : index
    %57 = vector.load %arg5[%c0_60, %c2_61, %c0_62, %c0_63] : memref<1x3x16x16xf32, #tpu.memory_space<vmem>>, vector<1x1x16x16xf32>
    %58 = vector.shape_cast %57 : vector<1x1x16x16xf32> to vector<16x16xf32>
    %59 = vector.shape_cast %52 : vector<16x16xf32> to vector<1x1x16x16xf32>
    tpu.vector_store %arg5[%c0_60, %c2_61, %c0_62, %c0_63], %59 {strides = array<i32>} : memref<1x3x16x16xf32, #tpu.memory_space<vmem>>, vector<1x1x16x16xf32>,
    %c0_64 = arith.constant 0 : index
    %c2_65 = arith.constant 2 : index
    %c0_66 = arith.constant 0 : index
    %c0_67 = arith.constant 0 : index
    %60 = vector.load %arg6[%c0_64, %c2_65, %c0_66, %c0_67] : memref<1x3x16x16xf32, #tpu.memory_space<vmem>>, vector<1x1x16x16xf32>
    %61 = vector.shape_cast %60 : vector<1x1x16x16xf32> to vector<16x16xf32>
    %62 = vector.shape_cast %56 : vector<16x16xf32> to vector<1x1x16x16xf32>
    tpu.vector_store %arg6[%c0_64, %c2_65, %c0_66, %c0_67], %62 {strides = array<i32>} : memref<1x3x16x16xf32, #tpu.memory_space<vmem>>, vector<1x1x16x16xf32>,
    %63 = arith.mulf %52, %3 : vector<16x16xf32>
    %64 = arith.mulf %56, %8 : vector<16x16xf32>
    %65 = arith.addf %63, %64 : vector<16x16xf32>
    %c0_68 = arith.constant 0 : index
    %c2_69 = arith.constant 2 : index
    %c0_70 = arith.constant 0 : index
    %c0_71 = arith.constant 0 : index
    %66 = vector.load %arg7[%c0_68, %c2_69, %c0_70, %c0_71] : memref<1x3x16x16xf32, #tpu.memory_space<vmem>>, vector<1x1x16x16xf32>
    %67 = vector.shape_cast %66 : vector<1x1x16x16xf32> to vector<16x16xf32>
    %68 = vector.shape_cast %65 : vector<16x16xf32> to vector<1x1x16x16xf32>
    tpu.vector_store %arg7[%c0_68, %c2_69, %c0_70, %c0_71], %68 {strides = array<i32>} : memref<1x3x16x16xf32, #tpu.memory_space<vmem>>, vector<1x1x16x16xf32>,
    %cst_72 = arith.constant 0.000000e+00 : f32
    %69 = vector.broadcast %cst_72 : f32 to vector<16x16xf32>
    %70 = arith.cmpf olt, %3, %69 : vector<16x16xf32>
    %cst_73 = arith.constant 0.000000e+00 : f32
    %71 = vector.broadcast %cst_73 : f32 to vector<16x16xf32>
    %72 = arith.select %70, %71, %3 : vector<16x16xi1>, vector<16x16xf32>
    %cst_74 = arith.constant 1.000000e+00 : f32
    %73 = vector.broadcast %cst_74 : f32 to vector<16x16xf32>
    %74 = arith.cmpf ogt, %72, %73 : vector<16x16xf32>
    %cst_75 = arith.constant 1.000000e+00 : f32
    %75 = vector.broadcast %cst_75 : f32 to vector<16x16xf32>
    %76 = arith.select %74, %75, %72 : vector<16x16xi1>, vector<16x16xf32>
    %cst_76 = arith.constant 0.000000e+00 : f32
    %77 = vector.broadcast %cst_76 : f32 to vector<16x16xf32>
    %78 = arith.cmpf ogt, %76, %77 : vector<16x16xf32>
    %cst_77 = arith.constant 1.000000e+00 : f32
    %79 = vector.broadcast %cst_77 : f32 to vector<16x16xf32>
    %80 = arith.cmpf olt, %76, %79 : vector<16x16xf32>
    %81 = arith.andi %78, %80 : vector<16x16xi1>
    %82 = arith.extui %81 : vector<16x16xi1> to vector<16x16xi32>
    %83 = arith.sitofp %82 : vector<16x16xi32> to vector<16x16xf32>
    %84 = vector.extract_strided_slice %83 {offsets = [1, 0], sizes = [15, 16], strides = [1, 1]} : vector<16x16xf32> to vector<15x16xf32>
    %cst_78 = arith.constant 0.000000e+00 : f32
    %85 = vector.broadcast %cst_78 : f32 to vector<1x16xf32>
    %86 = tpu.concatenate %84, %85 in 0 : vector<15x16xf32>, vector<1x16xf32> -> vector<16x16xf32>
    %87 = arith.maximumf %83, %86 : vector<16x16xf32>
    %cst_79 = arith.constant 0.000000e+00 : f32
    %88 = vector.broadcast %cst_79 : f32 to vector<1x16xf32>
    %89 = vector.extract_strided_slice %83 {offsets = [0, 0], sizes = [15, 16], strides = [1, 1]} : vector<16x16xf32> to vector<15x16xf32>
    %90 = tpu.concatenate %88, %89 in 0 : vector<1x16xf32>, vector<15x16xf32> -> vector<16x16xf32>
    %91 = arith.maximumf %87, %90 : vector<16x16xf32>
    %92 = vector.extract_strided_slice %83 {offsets = [2, 0], sizes = [14, 16], strides = [1, 1]} : vector<16x16xf32> to vector<14x16xf32>
    %cst_80 = arith.constant 0.000000e+00 : f32
    %93 = vector.broadcast %cst_80 : f32 to vector<2x16xf32>
    %94 = tpu.concatenate %92, %93 in 0 : vector<14x16xf32>, vector<2x16xf32> -> vector<16x16xf32>
    %95 = arith.maximumf %91, %94 : vector<16x16xf32>
    %cst_81 = arith.constant 0.000000e+00 : f32
    %96 = vector.broadcast %cst_81 : f32 to vector<2x16xf32>
    %97 = vector.extract_strided_slice %83 {offsets = [0, 0], sizes = [14, 16], strides = [1, 1]} : vector<16x16xf32> to vector<14x16xf32>
    %98 = tpu.concatenate %96, %97 in 0 : vector<2x16xf32>, vector<14x16xf32> -> vector<16x16xf32>
    %99 = arith.maximumf %95, %98 : vector<16x16xf32>
    %100 = vector.extract_strided_slice %99 {offsets = [0, 1], sizes = [16, 15], strides = [1, 1]} : vector<16x16xf32> to vector<16x15xf32>
    %cst_82 = arith.constant 0.000000e+00 : f32
    %101 = vector.broadcast %cst_82 : f32 to vector<16x1xf32>
    %102 = tpu.concatenate %100, %101 in 1 : vector<16x15xf32>, vector<16x1xf32> -> vector<16x16xf32>
    %103 = arith.maximumf %99, %102 : vector<16x16xf32>
    %cst_83 = arith.constant 0.000000e+00 : f32
    %104 = vector.broadcast %cst_83 : f32 to vector<16x1xf32>
    %105 = vector.extract_strided_slice %99 {offsets = [0, 0], sizes = [16, 15], strides = [1, 1]} : vector<16x16xf32> to vector<16x15xf32>
    %106 = tpu.concatenate %104, %105 in 1 : vector<16x1xf32>, vector<16x15xf32> -> vector<16x16xf32>
    %107 = arith.maximumf %103, %106 : vector<16x16xf32>
    %108 = vector.extract_strided_slice %99 {offsets = [0, 2], sizes = [16, 14], strides = [1, 1]} : vector<16x16xf32> to vector<16x14xf32>
    %cst_84 = arith.constant 0.000000e+00 : f32
    %109 = vector.broadcast %cst_84 : f32 to vector<16x2xf32>
    %110 = tpu.concatenate %108, %109 in 1 : vector<16x14xf32>, vector<16x2xf32> -> vector<16x16xf32>
    %111 = arith.maximumf %107, %110 : vector<16x16xf32>
    %cst_85 = arith.constant 0.000000e+00 : f32
    %112 = vector.broadcast %cst_85 : f32 to vector<16x2xf32>
    %113 = vector.extract_strided_slice %99 {offsets = [0, 0], sizes = [16, 14], strides = [1, 1]} : vector<16x16xf32> to vector<16x14xf32>
    %114 = tpu.concatenate %112, %113 in 1 : vector<16x2xf32>, vector<16x14xf32> -> vector<16x16xf32>
    %115 = arith.maximumf %111, %114 : vector<16x16xf32>
    %cst_86 = arith.constant 5.000000e-01 : f32
    %116 = vector.broadcast %cst_86 : f32 to vector<16x16xf32>
    %117 = arith.cmpf ogt, %115, %116 : vector<16x16xf32>
    %cst_87 = arith.constant 0.501960814 : f32
    %118 = vector.broadcast %cst_87 : f32 to vector<16x16xf32>
    %119 = arith.select %117, %118, %76 : vector<16x16xi1>, vector<16x16xf32>
    %c0_88 = arith.constant 0 : index
    %c0_89 = arith.constant 0 : index
    %c0_90 = arith.constant 0 : index
    %c0_91 = arith.constant 0 : index
    %120 = vector.load %arg8[%c0_88, %c0_89, %c0_90, %c0_91] : memref<1x1x16x16xf32, #tpu.memory_space<vmem>>, vector<1x1x16x16xf32>
    %121 = vector.shape_cast %120 : vector<1x1x16x16xf32> to vector<16x16xf32>
    %122 = vector.shape_cast %119 : vector<16x16xf32> to vector<1x1x16x16xf32>
    tpu.vector_store %arg8[%c0_88, %c0_89, %c0_90, %c0_91], %122 {strides = array<i32>} : memref<1x1x16x16xf32, #tpu.memory_space<vmem>>, vector<1x1x16x16xf32>,
    return
  }
  func.func @transform_0(%arg0: i32) -> (i32, i32, i32, i32) {
    %c0_i32 = arith.constant 0 : i32
    %c0_i32_0 = arith.constant 0 : i32
    %c0_i32_1 = arith.constant 0 : i32
    %c0_i32_2 = arith.constant 0 : i32
    return %arg0, %c0_i32, %c0_i32_0, %c0_i32_1 : i32, i32, i32, i32
  }
  func.func @transform_1(%arg0: i32) -> (i32, i32, i32, i32) {
    %c0_i32 = arith.constant 0 : i32
    %c0_i32_0 = arith.constant 0 : i32
    %c0_i32_1 = arith.constant 0 : i32
    %c0_i32_2 = arith.constant 0 : i32
    return %arg0, %c0_i32, %c0_i32_0, %c0_i32_1 : i32, i32, i32, i32
  }
  func.func @transform_2(%arg0: i32) -> (i32, i32, i32, i32) {
    %c0_i32 = arith.constant 0 : i32
    %c0_i32_0 = arith.constant 0 : i32
    %c0_i32_1 = arith.constant 0 : i32
    %c0_i32_2 = arith.constant 0 : i32
    return %arg0, %c0_i32, %c0_i32_0, %c0_i32_1 : i32, i32, i32, i32
  }
  func.func @transform_3(%arg0: i32) -> (i32, i32, i32, i32) {
    %c0_i32 = arith.constant 0 : i32
    %c0_i32_0 = arith.constant 0 : i32
    %c0_i32_1 = arith.constant 0 : i32
    %c0_i32_2 = arith.constant 0 : i32
    return %arg0, %c0_i32, %c0_i32_0, %c0_i32_1 : i32, i32, i32, i32
  }
  func.func @transform_4(%arg0: i32) -> (i32, i32, i32, i32) {
    %c0_i32 = arith.constant 0 : i32
    %c0_i32_0 = arith.constant 0 : i32
    %c0_i32_1 = arith.constant 0 : i32
    %c0_i32_2 = arith.constant 0 : i32
    return %arg0, %c0_i32, %c0_i32_0, %c0_i32_1 : i32, i32, i32, i32
  }
  func.func @transform_5(%arg0: i32) -> (i32, i32, i32, i32) {
    %c0_i32 = arith.constant 0 : i32
    %c0_i32_0 = arith.constant 0 : i32
    %c0_i32_1 = arith.constant 0 : i32
    %c0_i32_2 = arith.constant 0 : i32
    return %arg0, %c0_i32, %c0_i32_0, %c0_i32_1 : i32, i32, i32, i32
  }
  func.func @transform_6(%arg0: i32) -> (i32, i32, i32, i32) {
    %c0_i32 = arith.constant 0 : i32
    %c0_i32_0 = arith.constant 0 : i32
    %c0_i32_1 = arith.constant 0 : i32
    %c0_i32_2 = arith.constant 0 : i32
    return %arg0, %c0_i32, %c0_i32_0, %c0_i32_1 : i32, i32, i32, i32
  }
  func.func @transform_7(%arg0: i32) -> (i32, i32, i32, i32) {
    %c0_i32 = arith.constant 0 : i32
    %c0_i32_0 = arith.constant 0 : i32
    %c0_i32_1 = arith.constant 0 : i32
    %c0_i32_2 = arith.constant 0 : i32
    return %arg0, %c0_i32, %c0_i32_0, %c0_i32_1 : i32, i32, i32, i32
  }
}

</mosaic_0001>

<bundles_post_ra>
// kernel: tpu_custom_call.1
= control target key start
LH: loop header
LB: loop body
LE: loop exit
PB: predicated region body
PF: predicated region fallthrough
CT: control target
= control target key end

     0   :  { %s1917_s0 = inlined_call_operand.hbm [shape: f32[6,1,16,16], index: 0, kind: input, shape index: {}]   ;;  %s1918_s1 = inlined_call_operand.hbm [shape: f32[6,3,16,16], index: 1, kind: input, shape index: {}]   ;;  %s1919_s2 = inlined_call_operand.hbm [shape: f32[6,3,16,16], index: 2, kind: input, shape index: {}]   ;;  %s1920_s3 = inlined_call_operand.hbm [shape: f32[6,1,16,16], index: 3, kind: output, shape index: {0}]   ;;  %s1921_s4 = inlined_call_operand.hbm [shape: f32[6,3,16,16], index: 4, kind: output, shape index: {1}]   ;;  %s1922_s5 = inlined_call_operand.hbm [shape: f32[6,3,16,16], index: 5, kind: output, shape index: {2}]   ;;  %s1923_s6 = inlined_call_operand.hbm [shape: f32[6,3,16,16], index: 6, kind: output, shape index: {3}]   ;;  %s1924_s7 = inlined_call_operand.hbm [shape: f32[6,1,16,16], index: 7, kind: output, shape index: {4}]  }
   0x1   :  { %1940 = sst [smem:[#allocation24_spill]] %s1917_s0 }
   0x2   :  { %1941 = sst [smem:[#allocation25_spill]] %s1918_s1 }
   0x3   :  { %13 = vsyncpa [#allocation3], 0 }
   0x4   :  { %15 = vsyncpa [#allocation3 + $0x1], 0 }
   0x5   :  { %16 = vsyncpa [#allocation6], 0 }
   0x6   :  { %18 = vsyncpa [#allocation6 + $0x1], 0 }
   0x7   :  { %19 = vsyncpa [#allocation4], 0 }
   0x8   :  { %21 = vsyncpa [#allocation4 + $0x1], 0 }
   0x9   :  { %22 = vsyncpa [#allocation10], 0 }
   0xa   :  { %24 = vsyncpa [#allocation10 + $0x1], 0 }
   0xb   :  { %25 = vsyncpa [#allocation13], 0 }
   0xc   :  { %27 = vsyncpa [#allocation13 + $0x1], 0  ;;  %s1416_s24 = smov 0   ;;  %s1418_s25 = smov 0  }
   0xd   :  { %s1420_s26 = smov 0   ;;  %s1422_s27 = smov 0  }
   0xe LB: > { %1942 = sst [smem:[#allocation20_spill]] %s1353_s26  ;;  %s1437_s28 = sadd.s32 4294967295, %s1357_s27   ;;  %s1357_s27 = sphi %s1422_s27, %s1967_s27   ;;  %s1353_s26 = sphi %s1420_s26, %s1969_s26   ;;  %s1349_s25 = sphi %s1418_s25, %s1971_s25   ;;  %s1345_s24 = sphi %s1416_s24, %s1970_s24  }
   0xf   : > { %s1925_s29 = sadd.s32 4294967294, %s1357_s27   ;;  %s1441_s30 = sadd.s32 1, %s1357_s27  }
  0x10   : > { %1943 = sst [smem:[#allocation21_spill]] %s1441_s30  ;;  %s40_s8 = sadd.s32 1, %s1353_s26 }
  0x11   : > { %s37_s9 = ssub.s32 %s1357_s27, %s1441_s30  ;;  %p47_p0 = scmp.ne.s32.totalorder %s1353_s26, %s1349_s25 }
  0x12   : > { %p38_p1 = scmp.eq.s32.totalorder %s37_s9, 0  ;;  %p48_p2 = scmp.eq.s32.totalorder %s1357_s27, 0 }
  0x13   : > { %p53_p3 = scmp.ne.s32.totalorder %s1349_s25, %s1345_s24  ;;  %p54_p4 = scmp.eq.s32.totalorder %s1437_s28, 0 }
  0x14   : > { %s1453_s10 = scalar_select %p38_p1, %s1353_s26, %s40_s8  }
  0x15   : > { %p49_p5 = por %p48_p2, %p47_p0  ;;  %p1455_p6 = por %p54_p4, %p53_p3 }
  0x16   : > { %1944 = sst [smem:[#allocation22_spill]] %s1453_s10  ;;  %p129_p7 = scmp.eq.s32.totalorder %s1437_s28, 5 }
  0x17   : > { %s1945_s11 = scalar_select %p1455_p6, 1, 0 }
  0x18   : > { %p135_p8 = scmp.eq.s32.totalorder %s1925_s29, 5  ;;  %p1030_p9 = scmp.lt.s32.totalorder %s1357_s27, 6 }
  0x19   : > { %p1463_p10 = por %p129_p7, %p47_p0  ;;  %s1472_s14 = sand.u32 1, %s1353_s26  }
  0x1a   : > { %p1467_p11 = por %p135_p8, %p53_p3  ;;  %p1474_p12 = pnand %p1030_p9, %p49_p5 }
  0x1b   : > { %s1946_s12 = scalar_select %p1463_p10, 1, 0 }
  0x1c   : > { %s1947_s13 = scalar_select %p1467_p11, 1, 0 }
  0x1d   : > { %s280_s16 = sand.u32 1, %s1357_s27   ;;  %s1926_s17 = smul.u32 48, %s1472_s14 }
  0x1e   : > { %1948 = sst [smem:[#allocation23_spill]] %s1947_s13  ;;  %s1927_s18 = smul.u32 768, %s1357_s27 }
  0x1f   : > { %p940_p13 = scmp.ge.s32.totalorder %s1357_s27, 1  ;;  %p320_p0 = scmp.lt.s32.totalorder %s1357_s27, 7 }
  0x20   : > { %s1950_s1 = sld [smem:[#allocation25_spill]]  ;;  %s284_s22 = scalar_lea.vmem [#allocation5], %s1926_s17 }
  0x21   : > { %s291_s23 = sshll.u32 %s284_s22, 4  ;;  %p1494_p1 = pnand %p940_p13, %p320_p0  ;;  %s1492_s23 = int_to_ptr.vmem [resolvable:$true] %s291_s23 }
  0x22   : > { %s1498_s9 = scalar_lea.sflag [#allocation6], %s280_s16  ;;  %p1504_p3 = pneg %p1474_p12 }
  0x23   : > { %s1951_s8 = scalar_select %p1494_p1, 1, 0 }
  0x26   : > { %s1488_s21 = scalar_lea.hbm %s1950_s1, %s1927_s18  ;;  %s1098_s17 = scalar_lea.hbm %s1950_s1, 4608 }
  0x27   : > { %s1093_s29 = scalar_lea.hbm %s1488_s21, 768  ;;  %p1099_p7 = scmp.lt.s32.totalorder %s1488_s21, %s1950_s1 }
  0x28   : > { %p1094_p2 = scmp.ne.s32.totalorder %s1488_s21, %s1093_s29  ;;  %p1100_p8 = scmp.lt.s32.totalorder %s1098_s17, %s1093_s29 }
  0x2a   : > { %p1096_p4 = pnand %p1504_p3, %p1094_p2  ;;  %p1101_p9 = por %p1100_p8, %p1099_p7 }
  0x2c   : > { %p1097_p5 = pneg %p1096_p4 }
  0x2e   : > { %p1102_p13 = pnand %p1101_p9, %p1097_p5 }
  0x30   : > { %1105 = shalt.err (!%p1102_p13)
}
  0x31   : > { %s1106_s16 = scalar_lea.vmem %s1492_s23, 768  ;;  %s1359_s26 = smov [#allocation5]  }
  0x32   : > { %p1107_p0 = scmp.ne.s32.totalorder %s1492_s23, %s1106_s16  ;;  %s1111_s20 = sshll.u32 %s1359_s26, 4  ;;  %s1112_s20 = int_to_ptr.vmem [resolvable:$false] %s1111_s20 }
  0x33   : > { %s1113_s22 = scalar_lea.vmem %s1112_s20, 1536  ;;  %p1114_p11 = scmp.lt.s32.totalorder %s1492_s23, %s1112_s20 }
  0x34   : > { %p1109_p2 = pnand %p1107_p0, %p1504_p3  ;;  %p1115_p10 = scmp.lt.s32.totalorder %s1113_s22, %s1106_s16 }
  0x36   : > { %p1110_p4 = pneg %p1109_p2  ;;  %p1116_p6 = por %p1115_p10, %p1114_p11 }
  0x38   : > { %p1117_p1 = pnand %p1116_p6, %p1110_p4 }
  0x3a   : > { %1120 = shalt.err (!%p1117_p1)
}
  0x3b   : > { %s1934_s29 = smov 128   ;;  %s1361_s10 = smov 8  }
  0x3c   : > { %1010 = dma.hbm_to_vmem [thread:$0]  (!%p1474_p12), %s1488_s21, 768, %s1492_s23, %s1498_s9, %s1934_s29, %s1934_s29, %s1361_s10  }
  0x3d   : > { %s935_s26 = sshll.u32 %s1472_s14, 4  ;;  %s977_s17 = sshll.u32 %s1357_s27, 8 }
  0x3e   : > { %s1953_s0 = sld [smem:[#allocation24_spill]]  ;;  %s263_s22 = scalar_lea.vmem [#allocation2], %s935_s26 }
  0x3f   : > { %s270_s1 = sshll.u32 %s263_s22, 4  ;;  %s260_s30 = scalar_lea.sflag [#allocation3], %s1472_s14  ;;  %s1537_s1 = int_to_ptr.vmem [resolvable:$true] %s270_s1 }
  0x44   : > { %s1535_s20 = scalar_lea.hbm %s1953_s0, %s977_s17  ;;  %s1126_s29 = scalar_lea.hbm %s1953_s0, 1536 }
  0x45   : > { %s1121_s13 = scalar_lea.hbm %s1535_s20, 256  ;;  %p1127_p1 = scmp.lt.s32.totalorder %s1535_s20, %s1953_s0 }
  0x46   : > { %p1122_p6 = scmp.ne.s32.totalorder %s1535_s20, %s1121_s13  ;;  %p1128_p5 = scmp.lt.s32.totalorder %s1126_s29, %s1121_s13 }
  0x48   : > { %p1124_p10 = pnand %p1122_p6, %p1504_p3  ;;  %p1129_p7 = por %p1128_p5, %p1127_p1 }
  0x4a   : > { %p1125_p11 = pneg %p1124_p10 }
  0x4c   : > { %p1130_p8 = pnand %p1129_p7, %p1125_p11 }
  0x4e   : > { %1133 = shalt.err (!%p1130_p8)
}
  0x4f   : > { %s1134_s26 = scalar_lea.vmem %s1537_s1, 256  ;;  %s1362_s16 = smov [#allocation2]  }
  0x50   : > { %p1135_p9 = scmp.ne.s32.totalorder %s1537_s1, %s1134_s26  ;;  %s1139_s22 = sshll.u32 %s1362_s16, 4  ;;  %s1140_s22 = int_to_ptr.vmem [resolvable:$false] %s1139_s22 }
  0x51   : > { %s1141_s21 = scalar_lea.vmem %s1140_s22, 512  ;;  %p1142_p2 = scmp.lt.s32.totalorder %s1537_s1, %s1140_s22 }
  0x52   : > { %p1137_p13 = pnand %p1135_p9, %p1504_p3  ;;  %p1143_p4 = scmp.lt.s32.totalorder %s1141_s21, %s1134_s26 }
  0x54   : > { %p1138_p0 = pneg %p1137_p13  ;;  %p1144_p6 = por %p1143_p4, %p1142_p2 }
  0x56   : > { %p1145_p10 = pnand %p1144_p6, %p1138_p0 }
  0x58   : > { %1148 = shalt.err (!%p1145_p10)
}
  0x59   : > { %s1954_s13 = smov 128   ;;  %s1955_s29 = smul.u32 768, %s1357_s27 }
  0x5a   : > { %1007 = dma.hbm_to_vmem [thread:$0]  (!%p1474_p12), %s1535_s20, 256, %s1537_s1, %s260_s30, %s1954_s13, %s1954_s13, %s1361_s10  }
  0x5b   : > { %s1568_s17 = scalar_lea.hbm %s1919_s2, %s1955_s29  ;;  %s1956_s26 = smul.u32 48, %s1472_s14 }
  0x5c   : > { %s1149_s21 = scalar_lea.hbm %s1568_s17, 768  ;;  %s1154_s30 = scalar_lea.hbm %s1919_s2, 4608 }
  0x5d   : > { %s305_s16 = scalar_lea.vmem [#allocation7], %s1956_s26  ;;  %p1150_p11 = scmp.ne.s32.totalorder %s1568_s17, %s1149_s21 }
  0x5e   : > { %s312_s22 = sshll.u32 %s305_s16, 4  ;;  %p1155_p7 = scmp.lt.s32.totalorder %s1568_s17, %s1919_s2  ;;  %s313_s22 = int_to_ptr.vmem [resolvable:$true] %s312_s22 }
  0x5f   : > { %p1152_p1 = pnand %p1150_p11, %p1504_p3  ;;  %p1156_p8 = scmp.lt.s32.totalorder %s1154_s30, %s1149_s21 }
  0x61   : > { %p1153_p5 = pneg %p1152_p1  ;;  %p1157_p9 = por %p1156_p8, %p1155_p7 }
  0x63   : > { %p1158_p13 = pnand %p1157_p9, %p1153_p5 }
  0x65   : > { %1161 = shalt.err (!%p1158_p13)
}
  0x66   : > { %s1162_s14 = scalar_lea.vmem %s313_s22, 768  ;;  %s1363_s29 = smov [#allocation7]  }
  0x67   : > { %p1163_p0 = scmp.ne.s32.totalorder %s313_s22, %s1162_s14  ;;  %s1167_s18 = sshll.u32 %s1363_s29, 4  ;;  %s1168_s18 = int_to_ptr.vmem [resolvable:$false] %s1167_s18 }
  0x68   : > { %s1169_s26 = scalar_lea.vmem %s1168_s18, 1536  ;;  %p1170_p6 = scmp.lt.s32.totalorder %s313_s22, %s1168_s18 }
  0x69   : > { %p1165_p2 = pnand %p1163_p0, %p1504_p3  ;;  %p1171_p10 = scmp.lt.s32.totalorder %s1169_s26, %s1162_s14 }
  0x6b   : > { %p1166_p4 = pneg %p1165_p2  ;;  %p1172_p11 = por %p1171_p10, %p1170_p6 }
  0x6d   : > { %p1173_p1 = pnand %p1172_p11, %p1166_p4 }
  0x6f   : > { %1176 = shalt.err (!%p1173_p1)
}
  0x70   : > { %1013 = dma.hbm_to_vmem [thread:$0]  (!%p1474_p12), %s1568_s17, 768, %s313_s22, %s1498_s9, %s1954_s13, %s1954_s13, %s1361_s10  }
  0x71   : > { %p1957_p3 = scmp.ne.s32.totalorder %s1951_s8, 0 }
  0x72   : > { %s1595_s0 = sand.u32 (!%p1957_p3), 1, %s1349_s25   ;;  %p1958_p5 = scmp.ne.s32.totalorder (!%p1957_p3), %s1945_s11, 0 }
  0x73   : > { %324 = sbr.rel (%p1957_p3) target bundleno = 292 (0x124), region = 32  ;;  %s1598_s19 = sshll.u32 (!%p1957_p3), %s1595_s0, 4 }
  0x74   : > { %s327_s16 = scalar_lea.sflag (!%p1957_p3), [#allocation3], %s1595_s0  ;;  %s330_s15 = scalar_lea.vmem (!%p1957_p3), [#allocation2], %s1598_s19 }
  0x78   : > { %1324 = dma.done.wait (%p1958_p5), %s327_s16, 256  }
  0x79   : > { %1326 = vsyncadd (%p1958_p5), %s327_s16, 4294967040  ;;  %s1607_s8 = sand.u32 1, %s1437_s28   ;;  %s1610_s9 = smul.u32 48, %s1595_s0 }
  0x7a   : > { %s336_s10 = scalar_lea.sflag [#allocation6], %s1607_s8 }
  0x7b   : > { %s1614_s13 = scalar_lea.vmem [#allocation5], %s1610_s9 }
  0x7c   : > { %1328 = dma.done.wait (%p1958_p5), %s336_s10, 1536  }
  0x7d   : > { %1330 = vsyncadd (%p1958_p5), %s336_s10, 4294965760  ;;  %v409_v0 = vld [vmem:[%s330_s15] sm:$0xff]  ;;  %v410_v1 = vld [vmem:[%s330_s15 + $0x8] sm:$0xff]  ;;  %v1364_v8 = vmov 0.0   ;;  %vm517_vm10 = vcmask 1040384   ;;  %vm508_vm11 = vcmask 1046528  }
  0x7e   : > { %v1620_v2 = vmul.f32 0.003921569, %v409_v0  ;;  %v1622_v3 = vmul.f32 0.003921569, %v410_v1  ;;  %vm526_vm12 = vcmask 1045504   ;;  %vm535_vm13 = vcmask 1041408  }
  0x7f   : > { %v944_v33 = vld [vmem:[%s1614_s13 + $0x20] sm:$0xff]  ;;  %v945_v34 = vld [vmem:[%s1614_s13 + $0x28] sm:$0xff]  ;;  %v948_v35 = vld [vmem:[%s1614_s13 + $0x10] sm:$0xff]  ;;  %vm413_vm14 = vcmask 130048   ;;  %s348_s11 = scalar_lea.vmem [#allocation7], %s1610_s9  ;;  %s1652_s17 = smul.u32 768, %s1437_s28 }
  0x80   : > { %vm488_vm0 = vcmp.lt.f32.partialorder %v1620_v2, 0.0  ;;  %vm489_vm1 = vcmp.lt.f32.partialorder %v1622_v3, 0.0  ;;  %v421_v36 = vmul.f32 0.003921569, %v944_v33  ;;  %v422_v37 = vmul.f32 0.003921569, %v945_v34 }
  0x81   : > { %v490_v4 = vsel %vm488_vm0, 0.0, %v1620_v2  ;;  %v491_v5 = vsel %vm489_vm1, 0.0, %v1622_v3  ;;  %v949_v38 = vld [vmem:[%s1614_s13 + $0x18] sm:$0xff]  ;;  %v443_v41 = vmul.f32 0.003921569, %v948_v35  ;;  %v465_v43 = vld [vmem:[%s1614_s13] sm:$0xff]  ;;  %s1680_s14 = scalar_lea.hbm %s1921_s4, %s1652_s17  ;;  %s1697_s15 = scalar_lea.hbm %s1923_s6, %s1652_s17 }
  0x82   : > { %vm492_vm2 = vcmp.gt.f32.partialorder %v490_v4, 1.0  ;;  %vm493_vm3 = vcmp.gt.f32.partialorder %v491_v5, 1.0  ;;  %v444_v42 = vmul.f32 0.003921569, %v949_v38  ;;  %v466_v44 = vld [vmem:[%s1614_s13 + $0x8] sm:$0xff]  ;;  %v416_v46 = vsub.f32 1.0, %v1620_v2 }
  0x83   : > { %v1628_v6 = vsel %vm492_vm2, 1.0, %v490_v4  ;;  %v1630_v7 = vsel %vm493_vm3, 1.0, %v491_v5  ;;  %v467_v45 = vmul.f32 0.003921569, %v465_v43  ;;  %v417_v47 = vsub.f32 1.0, %v1622_v3  ;;  %v946_v50 = vld [vmem:[%s348_s11 + $0x20] sm:$0xff] }
  0x84   : > { %vm496_vm4 = vcmp.gt.f32.partialorder %v1628_v6, 0.0  ;;  %vm497_vm5 = vcmp.gt.f32.partialorder %v1630_v7, 0.0  ;;  %vm498_vm6 = vcmp.lt.f32.partialorder %v1628_v6, 1.0  ;;  %vm499_vm7 = vcmp.lt.f32.partialorder %v1630_v7, 1.0  ;;  %v947_v51 = vld [vmem:[%s348_s11 + $0x28] sm:$0xff]  ;;  %v950_v52 = vld [vmem:[%s348_s11 + $0x10] sm:$0xff] }
  0x85   : > { %vm500_vm8 = vmand %vm496_vm4, %vm498_vm6  ;;  %v468_v49 = vmul.f32 0.003921569, %v466_v44  ;;  %v1654_v53 = vmul.f32 0.003921569, %v946_v50  ;;  %v1656_v54 = vmul.f32 0.003921569, %v947_v51  ;;  %v432_v55 = vmul.f32 %v421_v36, %v1620_v2 }
  0x86   : > { %vm501_vm9 = vmand %vm497_vm5, %vm499_vm7  ;;  %v964_v9 = vsel %vm500_vm8, 1.0, %v1364_v8  ;;  %v433_v56 = vmul.f32 %v422_v37, %v1622_v3  ;;  %s1365_s22 = smov 127   ;;  %s1366_s21 = smov 126   ;;  %v951_v57 = vld [vmem:[%s348_s11 + $0x18] sm:$0xff]  ;;  %v1667_v58 = vmul.f32 0.003921569, %v950_v52  ;;  %v456_v59 = vmul.f32 %v443_v41, %v1620_v2 }
  0x87   : > { %v965_v10 = vsel %vm501_vm9, 1.0, %v1364_v8  ;;  %v509_v11 = vrot.slane %v964_v9, 1  ;;  %v518_v12 = vrot.slane %v964_v9, 7  ;;  %v527_v15 = vrot.slane %v964_v9, 2  ;;  %s387_s1 = scalar_lea.vmem [#allocation9], %s1610_s9  ;;  %v469_v61 = vld [vmem:[%s348_s11] sm:$0xff] }
  0x88   : > { %v510_v13 = vrot.slane %v965_v10, 1  ;;  %v519_v14 = vrot.slane %v965_v10, 7  ;;  %v528_v16 = vrot.slane %v965_v10, 2  ;;  %v536_v18 = vrot.slane %v964_v9, 6  ;;  %428 = vst.msk [vmem:[%s387_s1] sm:$0xff] %vm413_vm14, %v421_v36  ;;  %429 = vst.msk [vmem:[%s387_s1 + $0x8] sm:$0xff] %vm413_vm14, %v422_v37 }
  0x89   : > { %v523_v17 = vsel %vm517_vm10, 0.0, %v518_v12  ;;  %v537_v22 = vrot.slane %v965_v10, 6  ;;  %952 = vst.msk [vmem:[%s387_s1 + $0x10] sm:$0xff] %vm413_vm14, %v443_v41  ;;  %953 = vst.msk [vmem:[%s387_s1 + $0x18] sm:$0xff] %vm413_vm14, %v444_v42  ;;  %s646_s30 = sshll.u32 %s387_s1, 4  ;;  %v457_v60 = vmul.f32 %v444_v42, %v1622_v3  ;;  %v434_v62 = vmul.f32 %v1654_v53, %v416_v46  ;;  %v470_v1 = vld [vmem:[%s348_s11 + $0x8] sm:$0xff]  ;;  %s1688_s30 = int_to_ptr.vmem [resolvable:$true] %s646_s30 }
  0x8a   : > { %v511_v19 = vsel %vm508_vm11, %v509_v11, %v510_v13  ;;  %v514_v20 = vsel %vm508_vm11, %v510_v13, 0.0  ;;  %v520_v21 = vsel %vm517_vm10, %v518_v12, %v519_v14  ;;  %v529_v25 = vsel %vm526_vm12, %v527_v15, %v528_v16  ;;  %958 = vst.msk [vmem:[%s387_s1 + $0x20] sm:$0xff] %vm413_vm14, %v467_v45  ;;  %959 = vst.msk [vmem:[%s387_s1 + $0x28] sm:$0xff] %vm413_vm14, %v468_v49  ;;  %s1367_s29 = smov 1   ;;  %s1368_s18 = smov 2  }
  0x8b   : > { %v515_v23 = vmax.f32 %v964_v9, %v511_v19  ;;  %v516_v24 = vmax.f32 %v965_v10, %v514_v20  ;;  %v532_v26 = vsel %vm526_vm12, %v528_v16, 0.0  ;;  %v538_v29 = vsel %vm535_vm13, %v536_v18, %v537_v22  ;;  %s1700_s10 = scalar_lea.vmem [#allocation12], %s1610_s9  ;;  %s1936_s11 = scalar_lea.sflag [#allocation10], %s1607_s8 }
  0x8c   : > { %v541_v30 = vsel %vm535_vm13, 0.0, %v536_v18  ;;  %v435_v63 = vmul.f32 %v1656_v54, %v417_v47  ;;  %v1673_v0 = vmul.f32 0.003921569, %v951_v57  ;;  %v479_v4 = vmul.f32 %v467_v45, %v1620_v2  ;;  %s678_s13 = sshll.u32 %s1700_s10, 4  ;;  %p1959_p7 = scmp.ne.s32.totalorder %s1946_s12, 0  ;;  %s1737_s13 = int_to_ptr.vmem [resolvable:$true] %s678_s13 }
  0x8d   : > { %v524_v27 = vmax.f32 %v515_v23, %v523_v17  ;;  %v525_v28 = vmax.f32 %v516_v24, %v520_v21  ;;  %v458_v5 = vmul.f32 %v1667_v58, %v416_v46  ;;  %v1683_v8 = vmul.f32 0.003921569, %v469_v61 }
  0x8e   : > { %v1685_v9 = vmul.f32 0.003921569, %v470_v1  ;;  %v480_v10 = vmul.f32 %v468_v49, %v1622_v3  ;;  %v436_v11 = vadd.f32 %v434_v62, %v432_v55  ;;  %v437_v12 = vadd.f32 %v435_v63, %v433_v56 }
  0x8f   : > { %v533_v31 = vmax.f32 %v524_v27, %v529_v25  ;;  %v534_v32 = vmax.f32 %v525_v28, %v532_v26  ;;  %v459_v13 = vmul.f32 %v1673_v0, %v417_v47  ;;  %v460_v14 = vadd.f32 %v458_v5, %v456_v59 }
  0x90   : > { %v481_v15 = vmul.f32 %v1683_v8, %v416_v46  ;;  %v482_v16 = vmul.f32 %v1685_v9, %v417_v47 }
  0x91   : > { %v1640_v39 = vmax.f32 %v533_v31, %v541_v30  ;;  %v1642_v40 = vmax.f32 %v534_v32, %v538_v29 }
  0x93   : > { %v1073_v48 = vpack.i.bf16 %v1642_v40, %v1640_v39 }
  0x95   : > { %1074 = vrot.lane.b32.xlu0 %v1073_v48, %s1365_s22  ;;  %1084 = vrot.lane.b32.xlu1 %v1073_v48, %s1366_s21  ;;  %s1177_s22 = scalar_lea.vmem %s1688_s30, 768  ;;  %s1369_s21 = smov [#allocation9]  }
  0x96   : > { %p1178_p12 = scmp.ne.s32.totalorder %s1688_s30, %s1177_s22  ;;  %s1181_s1 = sshll.u32 %s1369_s21, 4  ;;  %s1182_s1 = int_to_ptr.vmem [resolvable:$false] %s1181_s1 }
  0x97   : > { %s1183_s20 = scalar_lea.vmem %s1182_s1, 1536  ;;  %p1184_p13 = scmp.lt.s32.totalorder %s1688_s30, %s1182_s1 }
  0x98   : > { %p1179_p8 = pnand %p1178_p12, %p1959_p7  ;;  %p1185_p0 = scmp.lt.s32.totalorder %s1183_s20, %s1177_s22 }
  0x99   : > { %1079 = vrot.lane.b32.xlu0 %v1073_v48, %s1367_s29  ;;  %1089 = vrot.lane.b32.xlu1 %v1073_v48, %s1368_s18 }
  0x9a   : > { %p1180_p9 = pneg %p1179_p8  ;;  %p1186_p2 = por %p1185_p0, %p1184_p13 }
  0x9c   : > { %p1187_p4 = pnand %p1186_p2, %p1180_p9 }
  0x9e   : > { %1190 = shalt.err (!%p1187_p4)
}
  0x9f   : > { %s1191_s23 = scalar_lea.hbm %s1680_s14, 768  ;;  %s1195_s26 = scalar_lea.hbm %s1921_s4, 4608 }
  0xa0   : > { %p1192_p6 = scmp.ne.s32.totalorder %s1680_s14, %s1191_s23  ;;  %p1196_p1 = scmp.lt.s32.totalorder %s1680_s14, %s1921_s4 }
  0xa1   : > { %p1197_p3 = scmp.lt.s32.totalorder %s1195_s26, %s1191_s23 }
  0xa2   : > { %p1193_p10 = pnand %p1192_p6, %p1959_p7 }
  0xa3   : > { %p1198_p5 = por %p1197_p3, %p1196_p1 }
  0xa4   : > { %p1194_p11 = pneg %p1193_p10 }
  0xa6   : > { %p1199_p12 = pnand %p1198_p5, %p1194_p11 }
  0xa8   : > { %1202 = shalt.err (!%p1199_p12)
}
  0xa9   : > { %s1937_s22 = smov 128   ;;  %s1371_s1 = smov 8   ;;  %438 = vst.msk [vmem:[%s1700_s10] sm:$0xff] %vm413_vm14, %v436_v11  ;;  %439 = vst.msk [vmem:[%s1700_s10 + $0x8] sm:$0xff] %vm413_vm14, %v437_v12  ;;  %v461_v17 = vadd.f32 %v459_v13, %v457_v60  ;;  %v483_v18 = vadd.f32 %v481_v15, %v479_v4  ;;  %v484_v19 = vadd.f32 %v482_v16, %v480_v10 }
  0xaa   : > { %995 = dma.vmem_to_hbm [thread:$0]  (%p1959_p7), %s1688_s30, 768, %s1680_s14, %s1936_s11, %s1937_s22, %s1937_s22, %s1371_s1  }
  0xab   : > { %956 = vst.msk [vmem:[%s1700_s10 + $0x10] sm:$0xff] %vm413_vm14, %v460_v14  ;;  %957 = vst.msk [vmem:[%s1700_s10 + $0x18] sm:$0xff] %vm413_vm14, %v461_v17  ;;  %s1742_s20 = scalar_lea.vmem [#allocation8], %s1598_s19  ;;  %s1939_s30 = sshll.u32 %s1437_s28, 8 }
  0xac   : > { %414 = vst.msk [vmem:[%s1742_s20] sm:$0xff] %vm413_vm14, %v1620_v2  ;;  %415 = vst.msk [vmem:[%s1742_s20 + $0x8] sm:$0xff] %vm413_vm14, %v1622_v3  ;;  %s1760_s29 = scalar_lea.hbm %s1920_s3, %s1939_s30  ;;  %s612_s26 = scalar_lea.sflag [#allocation13], %s1607_s8 }
  0xad   : > { %962 = vst.msk [vmem:[%s1700_s10 + $0x20] sm:$0xff] %vm413_vm14, %v483_v18  ;;  %963 = vst.msk [vmem:[%s1700_s10 + $0x28] sm:$0xff] %vm413_vm14, %v484_v19  ;;  %s1203_s16 = scalar_lea.vmem %s1737_s13, 768  ;;  %s1372_s21 = smov [#allocation12]  }
  0xae   : > { %p1204_p8 = scmp.ne.s32.totalorder %s1737_s13, %s1203_s16  ;;  %s1207_s11 = sshll.u32 %s1372_s21, 4  ;;  %s1208_s11 = int_to_ptr.vmem [resolvable:$false] %s1207_s11 }
  0xaf   : > { %s1209_s22 = scalar_lea.vmem %s1208_s11, 1536  ;;  %p1210_p0 = scmp.lt.s32.totalorder %s1737_s13, %s1208_s11 }
  0xb0   : > { %p1205_p9 = pnand %p1204_p8, %p1959_p7  ;;  %p1211_p2 = scmp.lt.s32.totalorder %s1209_s22, %s1203_s16 }
  0xb2   : > { %p1206_p13 = pneg %p1205_p9  ;;  %p1212_p4 = por %p1211_p2, %p1210_p0 }
  0xb4   : > { %p1213_p6 = pnand %p1212_p4, %p1206_p13 }
  0xb6   : > { %1216 = shalt.err (!%p1213_p6)
}
  0xb7   : > { %s1217_s10 = scalar_lea.hbm %s1697_s15, 768  ;;  %s1221_s21 = scalar_lea.hbm %s1923_s6, 4608 }
  0xb8   : > { %p1218_p10 = scmp.ne.s32.totalorder %s1697_s15, %s1217_s10  ;;  %p1222_p3 = scmp.lt.s32.totalorder %s1697_s15, %s1923_s6 }
  0xb9   : > { %p1223_p5 = scmp.lt.s32.totalorder %s1221_s21, %s1217_s10 }
  0xba   : > { %p1219_p11 = pnand %p1218_p10, %p1959_p7 }
  0xbb   : > { %p1224_p12 = por %p1223_p5, %p1222_p3 }
  0xbc   : > { %p1220_p1 = pneg %p1219_p11 }
  0xbe   : > { %p1225_p8 = pnand %p1224_p12, %p1220_p1 }
  0xc0   : > { %1228 = shalt.err (!%p1225_p8)
}
  0xc1   : > { %s1960_s11 = smov 128   ;;  %s1961_s22 = sshll.u32 %s1742_s20, 4  ;;  %s1791_s22 = int_to_ptr.vmem [resolvable:$true] %s1961_s22 }
  0xc2   : > { %997 = dma.vmem_to_hbm [thread:$0]  (%p1959_p7), %s1737_s13, 768, %s1697_s15, %s612_s26, %s1960_s11, %s1960_s11, %s1371_s1  }
  0xc3   : > { %s597_s30 = scalar_lea.sflag [#allocation4], %s1595_s0  ;;  %s1229_s18 = scalar_lea.vmem %s1791_s22, 256 }
  0xc4   : > { %p1230_p9 = scmp.ne.s32.totalorder %s1791_s22, %s1229_s18  ;;  %s1373_s16 = smov [#allocation8]  }
  0xc5   : > { %s1233_s10 = sshll.u32 %s1373_s16, 4  ;;  %s1234_s10 = int_to_ptr.vmem [resolvable:$false] %s1233_s10 }
  0xc6   : > { %p1231_p13 = pnand %p1230_p9, %p1959_p7  ;;  %s1235_s14 = scalar_lea.vmem %s1234_s10, 512 }
  0xc7   : > { %p1236_p2 = scmp.lt.s32.totalorder %s1791_s22, %s1234_s10  ;;  %p1237_p4 = scmp.lt.s32.totalorder %s1235_s14, %s1229_s18 }
  0xc8   : > { %p1232_p0 = pneg %p1231_p13 }
  0xc9   : > { %p1238_p6 = por %p1237_p4, %p1236_p2 }
  0xcb   : > { %p1239_p10 = pnand %p1238_p6, %p1232_p0 }
  0xcd   : > { %1242 = shalt.err (!%p1239_p10)
}
  0xce   : > { %s1243_s15 = scalar_lea.hbm %s1760_s29, 256  ;;  %s1247_s20 = scalar_lea.hbm %s1920_s3, 1536 }
  0xcf   : > { %p1244_p11 = scmp.ne.s32.totalorder %s1760_s29, %s1243_s15  ;;  %p1248_p5 = scmp.lt.s32.totalorder %s1760_s29, %s1920_s3 }
  0xd0   : > { %p1249_p12 = scmp.lt.s32.totalorder %s1247_s20, %s1243_s15 }
  0xd1   : > { %p1245_p1 = pnand %p1244_p11, %p1959_p7 }
  0xd2   : > { %p1250_p8 = por %p1249_p12, %p1248_p5 }
  0xd3   : > { %p1246_p3 = pneg %p1245_p1 }
  0xd5   : > { %p1251_p9 = pnand %p1250_p8, %p1246_p3 }
  0xd7   : > { %1254 = shalt.err (!%p1251_p9)
}
  0xd8   : > { %994 = dma.vmem_to_hbm [thread:$0]  (%p1959_p7), %s1791_s22, 256, %s1760_s29, %s597_s30, %s1960_s11, %s1960_s11, %s1371_s1  }
  0xd9   : > { %s1821_s10 = scalar_lea.hbm %s1922_s5, %s1652_s17  ;;  %s394_s14 = scalar_lea.vmem [#allocation11], %s1610_s9 }
  0xda   : > { %430 = vst.msk [vmem:[%s394_s14] sm:$0xff] %vm413_vm14, %v1654_v53  ;;  %431 = vst.msk [vmem:[%s394_s14 + $0x8] sm:$0xff] %vm413_vm14, %v1656_v54  ;;  %s662_s17 = sshll.u32 %s394_s14, 4  ;;  %s1374_s29 = smov [#allocation11]   ;;  %s663_s17 = int_to_ptr.vmem [resolvable:$true] %s662_s17 }
  0xdb   : > { %954 = vst.msk [vmem:[%s394_s14 + $0x10] sm:$0xff] %vm413_vm14, %v1667_v58  ;;  %955 = vst.msk [vmem:[%s394_s14 + $0x18] sm:$0xff] %vm413_vm14, %v1673_v0  ;;  %s1255_s9 = scalar_lea.vmem %s663_s17, 768  ;;  %s1259_s22 = sshll.u32 %s1374_s29, 4  ;;  %s1260_s22 = int_to_ptr.vmem [resolvable:$false] %s1259_s22 }
  0xdc   : > { %960 = vst.msk [vmem:[%s394_s14 + $0x20] sm:$0xff] %vm413_vm14, %v1683_v8  ;;  %961 = vst.msk [vmem:[%s394_s14 + $0x28] sm:$0xff] %vm413_vm14, %v1685_v9  ;;  %p1256_p13 = scmp.ne.s32.totalorder %s663_s17, %s1255_s9  ;;  %s1261_s30 = scalar_lea.vmem %s1260_s22, 1536 }
  0xdd   : > { %p1262_p4 = scmp.lt.s32.totalorder %s663_s17, %s1260_s22  ;;  %p1263_p6 = scmp.lt.s32.totalorder %s1261_s30, %s1255_s9 }
  0xde   : > { %p1257_p0 = pnand %p1256_p13, %p1959_p7 }
  0xdf   : > { %p1264_p10 = por %p1263_p6, %p1262_p4 }
  0xe0   : > { %p1258_p2 = pneg %p1257_p0 }
  0xe2   : > { %p1265_p11 = pnand %p1264_p10, %p1258_p2 }
  0xe4   : > { %1268 = shalt.err (!%p1265_p11)
}
  0xe5   : > { %s1269_s15 = scalar_lea.hbm %s1821_s10, 768  ;;  %s1273_s20 = scalar_lea.hbm %s1922_s5, 4608 }
  0xe6   : > { %p1270_p1 = scmp.ne.s32.totalorder %s1821_s10, %s1269_s15  ;;  %p1274_p12 = scmp.lt.s32.totalorder %s1821_s10, %s1922_s5 }
  0xe7   : > { %p1275_p8 = scmp.lt.s32.totalorder %s1273_s20, %s1269_s15 }
  0xe8   : > { %p1271_p3 = pnand %p1270_p1, %p1959_p7 }
  0xe9   : > { %p1276_p9 = por %p1275_p8, %p1274_p12 }
  0xea   : > { %p1272_p5 = pneg %p1271_p3 }
  0xec   : > { %p1277_p13 = pnand %p1276_p9, %p1272_p5 }
  0xee   : > { %1280 = shalt.err (!%p1277_p13)
}
  0xef   : > { %s1962_s18 = scalar_lea.sflag [#allocation10], %s1607_s8  ;;  %vm552_vm15 = vcmask 121856   ;;  %vm563_vm0 = vcmask 7168   ;;  %vm574_vm1 = vcmask 113664   ;;  %vm585_vm2 = vcmask 15360   ;;  %s408_s16 = scalar_lea.vmem [#allocation14], %s1598_s19 }
  0xf0   : > { %996 = dma.vmem_to_hbm [thread:$0]  (%p1959_p7), %s663_s17, 768, %s1821_s10, %s1962_s18, %s1960_s11, %s1960_s11, %s1371_s1  }
  0xf1   : > { %s694_s10 = sshll.u32 %s408_s16, 4  ;;  %s1963_s14 = sshll.u32 %s1437_s28, 8  ;;  %s1860_s10 = int_to_ptr.vmem [resolvable:$true] %s694_s10 }
  0xf2   : > { %s1867_s29 = scalar_lea.hbm %s1924_s7, %s1963_s14  ;;  %s1281_s19 = scalar_lea.vmem %s1860_s10, 256 }
  0xf3   : > { %p1282_p0 = scmp.ne.s32.totalorder %s1860_s10, %s1281_s19  ;;  %s1375_s22 = smov [#allocation14]  }
  0xf4   : > { %s1285_s28 = sshll.u32 %s1375_s22, 4  ;;  %s1286_s28 = int_to_ptr.vmem [resolvable:$false] %s1285_s28 }
  0xf5   : > { %p1283_p2 = pnand %p1282_p0, %p1959_p7  ;;  %s1287_s30 = scalar_lea.vmem %s1286_s28, 512 }
  0xf6   : > { %p1288_p6 = scmp.lt.s32.totalorder %s1860_s10, %s1286_s28  ;;  %p1289_p10 = scmp.lt.s32.totalorder %s1287_s30, %s1281_s19 }
  0xf7   : > { %p1284_p4 = pneg %p1283_p2 }
  0xf8   : > { %p1290_p11 = por %p1289_p10, %p1288_p6 }
  0xfa   : > { %p1291_p1 = pnand %p1290_p11, %p1284_p4 }
 0x107   : > { %v1075_v2 = vpop.permute.xlu0 %1074  ;;  %v1085_v3 = vpop.permute.xlu1 %1084 }
 0x108   : > { %v1077_v20 = vunpack.i.h.bf16 %v1075_v2  ;;  %v1076_v21 = vunpack.i.l.bf16 %v1075_v2  ;;  %v1087_v24 = vunpack.i.h.bf16 %v1085_v3  ;;  %v1086_v25 = vunpack.i.l.bf16 %v1085_v3 }
 0x10a   : > { %v554_v22 = vsel %vm552_vm15, %v1077_v20, 0.0  ;;  %v553_v23 = vsel %vm552_vm15, %v1076_v21, 0.0  ;;  %v576_v38 = vsel %vm574_vm1, %v1087_v24, 0.0  ;;  %v575_v41 = vsel %vm574_vm1, %v1086_v25, 0.0 }
 0x10b   : > { %v1080_v26 = vpop.permute.xlu0 %1079  ;;  %v1090_v27 = vpop.permute.xlu1 %1089  ;;  %v556_v32 = vmax.f32 %v1642_v40, %v554_v22  ;;  %v555_v33 = vmax.f32 %v1640_v39, %v553_v23 }
 0x10c   : > { %v1082_v28 = vunpack.i.h.bf16 %v1080_v26  ;;  %v1081_v29 = vunpack.i.l.bf16 %v1080_v26  ;;  %v1092_v30 = vunpack.i.h.bf16 %v1090_v27  ;;  %v1091_v31 = vunpack.i.l.bf16 %v1090_v27 }
 0x10e   : > { %v565_v34 = vsel %vm563_vm0, 0.0, %v1082_v28  ;;  %v564_v35 = vsel %vm563_vm0, 0.0, %v1081_v29  ;;  %v587_v42 = vsel %vm585_vm2, 0.0, %v1092_v30  ;;  %v586_v43 = vsel %vm585_vm2, 0.0, %v1091_v31 }
 0x10f   : > { %v566_v36 = vmax.f32 %v555_v33, %v564_v35  ;;  %v567_v37 = vmax.f32 %v556_v32, %v565_v34 }
 0x111   : > { %v577_v44 = vmax.f32 %v566_v36, %v575_v41  ;;  %v578_v45 = vmax.f32 %v567_v37, %v576_v38 }
 0x113   : > { %v588_v46 = vmax.f32 %v577_v44, %v586_v43  ;;  %v589_v40 = vmax.f32 %v578_v45, %v587_v42 }
 0x115   : > { %vm590_vm3 = vcmp.gt.f32.partialorder %v588_v46, 0.5  ;;  %vm591_vm4 = vcmp.gt.f32.partialorder %v589_v40, 0.5 }
 0x116   : > { %v592_v39 = vsel %vm590_vm3, 0.5019608, %v1628_v6  ;;  %v593_v47 = vsel %vm591_vm4, 0.5019608, %v1630_v7 }
 0x117   : > { %594 = vst.msk [vmem:[%s408_s16] sm:$0xff] %vm413_vm14, %v592_v39  ;;  %595 = vst.msk [vmem:[%s408_s16 + $0x8] sm:$0xff] %vm413_vm14, %v593_v47 }
 0x118   : > { %1294 = shalt.err (!%p1291_p1)
}
 0x119   : > { %s1295_s15 = scalar_lea.hbm %s1867_s29, 256  ;;  %s1299_s20 = scalar_lea.hbm %s1924_s7, 1536 }
 0x11a   : > { %p1296_p3 = scmp.ne.s32.totalorder %s1867_s29, %s1295_s15  ;;  %p1300_p8 = scmp.lt.s32.totalorder %s1867_s29, %s1924_s7 }
 0x11b   : > { %p1301_p9 = scmp.lt.s32.totalorder %s1299_s20, %s1295_s15 }
 0x11c   : > { %p1297_p5 = pnand %p1296_p3, %p1959_p7 }
 0x11d   : > { %p1302_p13 = por %p1301_p9, %p1300_p8 }
 0x11e   : > { %p1298_p12 = pneg %p1297_p5 }
 0x120   : > { %p1303_p0 = pnand %p1302_p13, %p1298_p12 }
 0x122   : > { %1306 = shalt.err (!%p1303_p0)
}
 0x123   : > { %998 = dma.vmem_to_hbm [thread:$0]  (%p1959_p7), %s1860_s10, 256, %s1867_s29, %s612_s26, %s1960_s11, %s1960_s11, %s1371_s1  }
 0x124 PF: > { %s1964_s18 = sld [smem:[#allocation23_spill]]  ;;  %p1031_p2 = scmp.ge.s32.totalorder %s1357_s27, 2 }
 0x125   : > { %s709_s16 = sand.u32 1, %s1345_s24  }
 0x126   : > { %s710_s14 = scalar_lea.sflag [#allocation4], %s709_s16 }
 0x12a   : > { %p1965_p4 = scmp.ne.s32.totalorder %s1964_s18, 0 }
 0x12c   : > { %p1015_p6 = pnand %p1031_p2, %p1965_p4 }
 0x12e   : > { %p1016_p10 = pneg %p1015_p6 }
 0x130   : > { %1332 = dma.done.wait (%p1016_p10), %s710_s14, 256  }
 0x131   : > { %1334 = vsyncadd (%p1016_p10), %s710_s14, 4294967040  ;;  %s1966_s12 = sadd.s32 4294967294, %s1357_s27  }
 0x132   : > { %s718_s17 = sand.u32 1, %s1966_s12  }
 0x133   : > { %s719_s9 = scalar_lea.sflag [#allocation10], %s718_s17 }
 0x134   : > { %1336 = dma.done.wait (%p1016_p10), %s719_s9, 1536  }
 0x135   : > { %1338 = vsyncadd (%p1016_p10), %s719_s9, 4294965760  ;;  %s737_s8 = scalar_lea.sflag [#allocation13], %s718_s17 }
 0x136   : > { %1340 = dma.done.wait (%p1016_p10), %s737_s8, 1024  }
 0x137   : > { %1342 = vsyncadd (%p1016_p10), %s737_s8, 4294966272  ;;  %s1967_s27 = sld [smem:[#allocation21_spill]]  ;;  %s1970_s24 = smov %s1349_s25 }
 0x138   : > { %s1968_s1 = sld [smem:[#allocation20_spill]] }
 0x139   : > { %s1969_s26 = sld [smem:[#allocation22_spill]] }
 0x13d   : > { %p30_p7 = scmp.ge.s32.totalorder %s1967_s27, 8  }
 0x13e   : > { %s1971_s25 = smov %s1968_s1 }
 0x13f   :  { %32 = sbr.rel (!%p30_p7) target bundleno = 14 (0xe), region = 175 }
 0x144   :  { %751 = vsyncpa [#allocation3], 1 }
 0x145   :  { %753 = vsyncpa [#allocation3 + $0x1], 1 }
 0x146   :  { %754 = vsyncpa [#allocation6], 1 }
 0x147   :  { %756 = vsyncpa [#allocation6 + $0x1], 1 }
 0x148   :  { %757 = vsyncpa [#allocation4], 1 }
 0x149   :  { %759 = vsyncpa [#allocation4 + $0x1], 1 }
 0x14a   :  { %760 = vsyncpa [#allocation10], 1 }
 0x14b   :  { %762 = vsyncpa [#allocation10 + $0x1], 1 }
 0x14c   :  { %763 = vsyncpa [#allocation13], 1 }
 0x14d   :  { %765 = vsyncpa [#allocation13 + $0x1], 1 }

</bundles_post_ra>
